<compile_context>
chip_gen: v7x
topology: tpu7x:2x2x1
jax: 0.10.0
libtpu: 0.0.40
codegen_flags: <defaults>
</compile_context>

<pallas_src>
import numpy as np
import jax
import jax.numpy as jnp
from jax.experimental import pallas as pl
from jax.experimental.pallas import tpu as pltpu


_DEFAULT_LOOKAHEAD = 16  # in-flight row DMAs per chunk (review: 16-32; 8-16 is enough on v5e)


# ----------------------------- Pallas kernel -------------------------------- #

def gather_rows_dma(src, src_sched, dst_sched, n_out_rows, *,
                    lookahead=_DEFAULT_LOOKAHEAD, num_cores=1):
    """out[dst_sched[r]] = src[src_sched[r]] for every scheduled r, using direct
    HBM->HBM row DMAs with a sliding window of `lookahead` copies in flight.

    src:        (N, ...) device array; stays in HBM, never staged through VMEM.
    src_sched:  (B_pad,) host int32 array of source row indices.
    dst_sched:  (B_pad,) host int32 array of destination row indices (< n_out_rows).
    """
    N = src.shape[0]
    src2 = src.reshape(N, -1)          # each source row = one contiguous HBM range
    row_elems = src2.shape[1]

    B_pad = int(src_sched.shape[0])
    n_chunks = max(1, int(num_cores))
    assert B_pad % n_chunks == 0, "schedule must be padded to a multiple of num_cores"
    R = B_pad // n_chunks              # rows per chunk (static)
    K = max(1, min(int(lookahead), R))  # in-flight window per chunk (static)

    def kernel(src_ref, dst_ref, in_hbm, out_hbm, sems):
        base = pl.program_id(0) * R

        def copy(slot, r):
            # Descriptor is rebuilt from the actual (src, dst) rows for both the
            # start and the wait, so the wait always matches the started copy.
            s = src_ref[base + r]          # SMEM scalar reads
            d = dst_ref[base + r]
            return pltpu.make_async_copy(in_hbm.at[s], out_hbm.at[d], sems.at[slot])

        # Prologue: fill the window (K copies in flight).  Static unroll.
        for j in range(K):
            copy(j, j).start()

        # Steady state: retire the oldest copy, immediately refill its slot.
        # The queue therefore never drains between rows.
        if R > K:
            @pl.loop(0, R - K)
            def _(r):
                slot = r % K
                copy(slot, r).wait()
                copy(slot, r + K).start()

        # Epilogue: drain the last K in-flight copies.
        @pl.loop(R - K, R)
        def _(r):
            copy(r % K, r).wait()

    hbm = pl.BlockSpec(memory_space=pl.ANY)
    if n_chunks > 1:
        # v7x opt-in: actually shard chunks across the two TensorCores.
        dim_sem = (pltpu.CORE_PARALLEL,)
    else:
        dim_sem = ("arbitrary",)

    out = pl.pallas_call(
        kernel,
        out_shape=jax.ShapeDtypeStruct((n_out_rows, row_elems), src2.dtype),
        grid_spec=pltpu.PrefetchScalarGridSpec(
            num_scalar_prefetch=2,
            grid=(n_chunks,),
            in_specs=[hbm],
            out_specs=hbm,
            scratch_shapes=[pltpu.SemaphoreType.DMA((K,))],
        ),
        compiler_params=pltpu.CompilerParams(dimension_semantics=dim_sem),
    )(jnp.asarray(src_sched, jnp.int32), jnp.asarray(dst_sched, jnp.int32), src2)

    return out.reshape((n_out_rows,) + src.shape[1:])


# Small per-sample tensors: one fused XLA gather (single dispatch) instead of
# per-row DMAs or multiple separate fancy-index launches.
@jax.jit
def _gather_small(audio, text, target, idx):
    return (jnp.take(audio, idx, axis=0),
            jnp.take(text, idx, axis=0),
            jnp.take(target, idx, axis=0))


# ------------------------- Module (host-side glue) --------------------------- #

class VideoWeightedOverUnderSampling:
    def __init__(self, batch_size: int, num_group: int = 2, tau: float = 0.2,
                 *, lookahead: int = _DEFAULT_LOOKAHEAD, num_cores: int = 1):
        self._num_group = num_group
        self._batch_size = batch_size
        self._sampling_size = batch_size // num_group
        self._tau = tau
        self._lookahead = lookahead
        self._num_cores = num_cores        # set 2 on v7x (CORE_PARALLEL chunking)
        self.last_indices = None

    def _cal_weights(self, group_others: np.ndarray):
        # weights_list[c] = (n_c / n) ** tau, normalized over classes.
        num_group_others = int(group_others.max()) + 1
        n = group_others.shape[0]
        raw = [((group_others == i).sum() / n) ** self._tau
               for i in range(num_group_others)]
        s = float(sum(raw))
        return [float(w) / s for w in raw]

    def _compute_indices(self, batch_group: np.ndarray,
                         batch_group_others: np.ndarray, seed: int) -> np.ndarray:
        # Reproduces the torch.where / multinomial / cat / randperm pipeline on
        # the host (NumPy PRNG), so no device work is blocked on it.
        # TODO(synk): torch.multinomial/randperm PRNG streams have no bitwise
        # NumPy/JAX equivalent; sampling is distributionally equivalent only.
        rng = np.random.default_rng(seed)
        gathered = []
        for i in range(self._num_group):
            members = np.where(batch_group == i)[0]
            if members.size == 0:
                raise ValueError(f"group {i} has no members in the batch")
            group_others = batch_group_others[members]
            weights_list = self._cal_weights(group_others)
            w = np.array([weights_list[g] for g in group_others], dtype=np.float64)
            p = w / w.sum()
            idx = rng.choice(members.size, size=self._sampling_size,
                             replace=True, p=p)
            gathered.append(members[idx])
        cat = np.concatenate(gathered, axis=0)
        if cat.shape[0] != self._batch_size:
            raise ValueError(
                "num_group * (batch_size // num_group) must equal batch_size")
        perm = rng.permutation(self._batch_size)
        final = cat[perm].astype(np.int64)
        # Hard bounds check: the DMA gather has no runtime bounds checking, and
        # silently clipping would mask host-side bugs.
        if final.min() < 0 or final.max() >= self._batch_size:
            raise ValueError("gather index out of range")
        return final.astype(np.int32)

    def _build_schedule(self, idx: np.ndarray):
        """(src, dst) schedule, padded to a multiple of num_cores so the kernel
        needs no per-row bounds guards. Pad slots redundantly re-copy the last
        row (same src AND same dst -> identical bytes, race-free in effect)."""
        B = idx.shape[0]
        n_chunks = max(1, self._num_cores)
        R = -(-B // n_chunks)
        B_pad = n_chunks * R
        src = np.empty((B_pad,), np.int32)
        dst = np.empty((B_pad,), np.int32)
        src[:B] = idx
        dst[:B] = np.arange(B, dtype=np.int32)
        if B_pad > B:
            src[B:] = idx[B - 1]
            dst[B:] = B - 1
        return src, dst

    def __call__(self, seed, batch_video, batch_audio, batch_text,
                 batch_target, batch_group, batch_group_others):
        """batch_group / batch_group_others should be HOST (NumPy) arrays; passing
        device arrays forces a device->host sync before index computation."""
        group_np = np.asarray(batch_group)
        group_others_np = np.asarray(batch_group_others)
        idx = self._compute_indices(group_np, group_others_np, int(seed))
        self.last_indices = idx
        src_sched, dst_sched = self._build_schedule(idx)

        # Hot path: gather the big video rows with the Pallas sliding-window
        # DMA kernel.
        video = gather_rows_dma(batch_video, src_sched, dst_sched,
                                self._batch_size,
                                lookahead=self._lookahead,
                                num_cores=self._num_cores)

        # Small tensors: one fused XLA gather; group labels gathered on host.
        idx_dev = jnp.asarray(idx)
        audio, text, target = _gather_small(batch_audio, batch_text,
                                            batch_target, idx_dev)
        group = jnp.asarray(group_np[idx])
        return video, audio, text, target, group


# ---------------------------------- main ------------------------------------ #

if __name__ == "__main__":
    key = jax.random.PRNGKey(0)
    k_v, k_a, k_t, k_tar = jax.random.split(key, 4)

    B = 24  # > lookahead, so prologue / steady-state / epilogue are all exercised
    video = jax.random.normal(k_v, (B, 4, 3, 8, 8), jnp.float32)   # (B, T, C, H, W)
    audio = jax.random.normal(k_a, (B, 128), jnp.float32)          # (B, A)
    text = jax.random.normal(k_t, (B, 8, 32), jnp.float32)         # (B, L, D)
    target = jax.random.normal(k_tar, (B,), jnp.float32)
    # Group labels stay host-resident (NumPy) -> no device sync before the
    # index pipeline.
    group = np.array([i % 2 for i in range(B)], np.int32)
    group_others = np.array([(i // 2) % 3 for i in range(B)], np.int32)

    sampler = VideoWeightedOverUnderSampling(batch_size=B, num_group=2, tau=0.2,
                                             lookahead=16)
    out = sampler(1234, video, audio, text, target, group, group_others)
    out = jax.block_until_ready(out)
    v_out, a_out, t_out, tar_out, grp_out = out
    final_idx = sampler.last_indices

    # Verify the Pallas DMA gather against a plain host reference gather.
    np.testing.assert_array_equal(np.asarray(v_out), np.asarray(video)[final_idx])
    np.testing.assert_array_equal(np.asarray(a_out), np.asarray(audio)[final_idx])
    np.testing.assert_array_equal(np.asarray(t_out), np.asarray(text)[final_idx])
    np.testing.assert_array_equal(np.asarray(tar_out), np.asarray(target)[final_idx])
    np.testing.assert_array_equal(np.asarray(grp_out), group[final_idx])
    assert v_out.shape == video.shape and grp_out.shape == group.shape

    print("KERNEL_OK")
</pallas_src>

<mosaic_0001>
module attributes {stable_mosaic.version = 11 : i64} {
  func.func @kernel(%arg0: i32, %arg1: memref<24xi32, #tpu.memory_space<smem>>, %arg2: memref<24xi32, #tpu.memory_space<smem>>, %arg3: memref<24x768xf32, #tpu.memory_space<any>>, %arg4: memref<24x768xf32, #tpu.memory_space<any>>, %arg5: memref<16x!tpu.dma_semaphore, #tpu.memory_space<semaphore_mem>>) attributes {dimension_semantics = [#tpu.dimension_semantics<arbitrary>], iteration_bounds = array<i64: 1>, scalar_prefetch = 2 : i64, scratch_operands = 1 : i64, tpu.core_type = #tpu.core_type<tc>, window_params = [{}, {}]} {
    %c24_i32 = arith.constant 24 : i32
    %0 = arith.muli %arg0, %c24_i32 : i32
    %c0_i32 = arith.constant 0 : i32
    %1 = arith.addi %0, %c0_i32 : i32
    %2 = arith.index_cast %1 : i32 to index
    %3 = memref.load %arg1[%2] : memref<24xi32, #tpu.memory_space<smem>>
    %c0_i32_0 = arith.constant 0 : i32
    %4 = arith.addi %0, %c0_i32_0 : i32
    %5 = arith.index_cast %4 : i32 to index
    %6 = memref.load %arg2[%5] : memref<24xi32, #tpu.memory_space<smem>>
    %c0_i32_1 = arith.constant 0 : i32
    %c0_i32_2 = arith.constant 0 : i32
    %7 = tpu.memref_slice %arg3[%3, %c0_i32_2] : memref<24x768xf32, #tpu.memory_space<any>> -> memref<1x768xf32, #tpu.memory_space<any>>
    %8 = tpu.memref_squeeze %7 : memref<1x768xf32, #tpu.memory_space<any>> -> memref<768xf32, #tpu.memory_space<any>>
    %c0_i32_3 = arith.constant 0 : i32
    %9 = tpu.memref_slice %arg4[%6, %c0_i32_3] : memref<24x768xf32, #tpu.memory_space<any>> -> memref<1x768xf32, #tpu.memory_space<any>>
    %10 = tpu.memref_squeeze %9 : memref<1x768xf32, #tpu.memory_space<any>> -> memref<768xf32, #tpu.memory_space<any>>
    %11 = tpu.memref_slice %arg5[%c0_i32_1] : memref<16x!tpu.dma_semaphore, #tpu.memory_space<semaphore_mem>> -> memref<1x!tpu.dma_semaphore, #tpu.memory_space<semaphore_mem>>
    %12 = tpu.memref_squeeze %11 : memref<1x!tpu.dma_semaphore, #tpu.memory_space<semaphore_mem>> -> memref<!tpu.dma_semaphore, #tpu.memory_space<semaphore_mem>>
    tpu.enqueue_dma source(%8 : memref<768xf32, #tpu.memory_space<any>>) target(%10 : memref<768xf32, #tpu.memory_space<any>>) target_semaphore(%12 : memref<!tpu.dma_semaphore, #tpu.memory_space<semaphore_mem>>)
    %c1_i32 = arith.constant 1 : i32
    %13 = arith.addi %0, %c1_i32 : i32
    %14 = arith.index_cast %13 : i32 to index
    %15 = memref.load %arg1[%14] : memref<24xi32, #tpu.memory_space<smem>>
    %c1_i32_4 = arith.constant 1 : i32
    %16 = arith.addi %0, %c1_i32_4 : i32
    %17 = arith.index_cast %16 : i32 to index
    %18 = memref.load %arg2[%17] : memref<24xi32, #tpu.memory_space<smem>>
    %c1_i32_5 = arith.constant 1 : i32
    %c0_i32_6 = arith.constant 0 : i32
    %19 = tpu.memref_slice %arg3[%15, %c0_i32_6] : memref<24x768xf32, #tpu.memory_space<any>> -> memref<1x768xf32, #tpu.memory_space<any>>
    %20 = tpu.memref_squeeze %19 : memref<1x768xf32, #tpu.memory_space<any>> -> memref<768xf32, #tpu.memory_space<any>>
    %c0_i32_7 = arith.constant 0 : i32
    %21 = tpu.memref_slice %arg4[%18, %c0_i32_7] : memref<24x768xf32, #tpu.memory_space<any>> -> memref<1x768xf32, #tpu.memory_space<any>>
    %22 = tpu.memref_squeeze %21 : memref<1x768xf32, #tpu.memory_space<any>> -> memref<768xf32, #tpu.memory_space<any>>
    %23 = tpu.memref_slice %arg5[%c1_i32_5] : memref<16x!tpu.dma_semaphore, #tpu.memory_space<semaphore_mem>> -> memref<1x!tpu.dma_semaphore, #tpu.memory_space<semaphore_mem>>
    %24 = tpu.memref_squeeze %23 : memref<1x!tpu.dma_semaphore, #tpu.memory_space<semaphore_mem>> -> memref<!tpu.dma_semaphore, #tpu.memory_space<semaphore_mem>>
    tpu.enqueue_dma source(%20 : memref<768xf32, #tpu.memory_space<any>>) target(%22 : memref<768xf32, #tpu.memory_space<any>>) target_semaphore(%24 : memref<!tpu.dma_semaphore, #tpu.memory_space<semaphore_mem>>)
    %c2_i32 = arith.constant 2 : i32
    %25 = arith.addi %0, %c2_i32 : i32
    %26 = arith.index_cast %25 : i32 to index
    %27 = memref.load %arg1[%26] : memref<24xi32, #tpu.memory_space<smem>>
    %c2_i32_8 = arith.constant 2 : i32
    %28 = arith.addi %0, %c2_i32_8 : i32
    %29 = arith.index_cast %28 : i32 to index
    %30 = memref.load %arg2[%29] : memref<24xi32, #tpu.memory_space<smem>>
    %c2_i32_9 = arith.constant 2 : i32
    %c0_i32_10 = arith.constant 0 : i32
    %31 = tpu.memref_slice %arg3[%27, %c0_i32_10] : memref<24x768xf32, #tpu.memory_space<any>> -> memref<1x768xf32, #tpu.memory_space<any>>
    %32 = tpu.memref_squeeze %31 : memref<1x768xf32, #tpu.memory_space<any>> -> memref<768xf32, #tpu.memory_space<any>>
    %c0_i32_11 = arith.constant 0 : i32
    %33 = tpu.memref_slice %arg4[%30, %c0_i32_11] : memref<24x768xf32, #tpu.memory_space<any>> -> memref<1x768xf32, #tpu.memory_space<any>>
    %34 = tpu.memref_squeeze %33 : memref<1x768xf32, #tpu.memory_space<any>> -> memref<768xf32, #tpu.memory_space<any>>
    %35 = tpu.memref_slice %arg5[%c2_i32_9] : memref<16x!tpu.dma_semaphore, #tpu.memory_space<semaphore_mem>> -> memref<1x!tpu.dma_semaphore, #tpu.memory_space<semaphore_mem>>
    %36 = tpu.memref_squeeze %35 : memref<1x!tpu.dma_semaphore, #tpu.memory_space<semaphore_mem>> -> memref<!tpu.dma_semaphore, #tpu.memory_space<semaphore_mem>>
    tpu.enqueue_dma source(%32 : memref<768xf32, #tpu.memory_space<any>>) target(%34 : memref<768xf32, #tpu.memory_space<any>>) target_semaphore(%36 : memref<!tpu.dma_semaphore, #tpu.memory_space<semaphore_mem>>)
    %c3_i32 = arith.constant 3 : i32
    %37 = arith.addi %0, %c3_i32 : i32
    %38 = arith.index_cast %37 : i32 to index
    %39 = memref.load %arg1[%38] : memref<24xi32, #tpu.memory_space<smem>>
    %c3_i32_12 = arith.constant 3 : i32
    %40 = arith.addi %0, %c3_i32_12 : i32
    %41 = arith.index_cast %40 : i32 to index
    %42 = memref.load %arg2[%41] : memref<24xi32, #tpu.memory_space<smem>>
    %c3_i32_13 = arith.constant 3 : i32
    %c0_i32_14 = arith.constant 0 : i32
    %43 = tpu.memref_slice %arg3[%39, %c0_i32_14] : memref<24x768xf32, #tpu.memory_space<any>> -> memref<1x768xf32, #tpu.memory_space<any>>
    %44 = tpu.memref_squeeze %43 : memref<1x768xf32, #tpu.memory_space<any>> -> memref<768xf32, #tpu.memory_space<any>>
    %c0_i32_15 = arith.constant 0 : i32
    %45 = tpu.memref_slice %arg4[%42, %c0_i32_15] : memref<24x768xf32, #tpu.memory_space<any>> -> memref<1x768xf32, #tpu.memory_space<any>>
    %46 = tpu.memref_squeeze %45 : memref<1x768xf32, #tpu.memory_space<any>> -> memref<768xf32, #tpu.memory_space<any>>
    %47 = tpu.memref_slice %arg5[%c3_i32_13] : memref<16x!tpu.dma_semaphore, #tpu.memory_space<semaphore_mem>> -> memref<1x!tpu.dma_semaphore, #tpu.memory_space<semaphore_mem>>
    %48 = tpu.memref_squeeze %47 : memref<1x!tpu.dma_semaphore, #tpu.memory_space<semaphore_mem>> -> memref<!tpu.dma_semaphore, #tpu.memory_space<semaphore_mem>>
    tpu.enqueue_dma source(%44 : memref<768xf32, #tpu.memory_space<any>>) target(%46 : memref<768xf32, #tpu.memory_space<any>>) target_semaphore(%48 : memref<!tpu.dma_semaphore, #tpu.memory_space<semaphore_mem>>)
    %c4_i32 = arith.constant 4 : i32
    %49 = arith.addi %0, %c4_i32 : i32
    %50 = arith.index_cast %49 : i32 to index
    %51 = memref.load %arg1[%50] : memref<24xi32, #tpu.memory_space<smem>>
    %c4_i32_16 = arith.constant 4 : i32
    %52 = arith.addi %0, %c4_i32_16 : i32
    %53 = arith.index_cast %52 : i32 to index
    %54 = memref.load %arg2[%53] : memref<24xi32, #tpu.memory_space<smem>>
    %c4_i32_17 = arith.constant 4 : i32
    %c0_i32_18 = arith.constant 0 : i32
    %55 = tpu.memref_slice %arg3[%51, %c0_i32_18] : memref<24x768xf32, #tpu.memory_space<any>> -> memref<1x768xf32, #tpu.memory_space<any>>
    %56 = tpu.memref_squeeze %55 : memref<1x768xf32, #tpu.memory_space<any>> -> memref<768xf32, #tpu.memory_space<any>>
    %c0_i32_19 = arith.constant 0 : i32
    %57 = tpu.memref_slice %arg4[%54, %c0_i32_19] : memref<24x768xf32, #tpu.memory_space<any>> -> memref<1x768xf32, #tpu.memory_space<any>>
    %58 = tpu.memref_squeeze %57 : memref<1x768xf32, #tpu.memory_space<any>> -> memref<768xf32, #tpu.memory_space<any>>
    %59 = tpu.memref_slice %arg5[%c4_i32_17] : memref<16x!tpu.dma_semaphore, #tpu.memory_space<semaphore_mem>> -> memref<1x!tpu.dma_semaphore, #tpu.memory_space<semaphore_mem>>
    %60 = tpu.memref_squeeze %59 : memref<1x!tpu.dma_semaphore, #tpu.memory_space<semaphore_mem>> -> memref<!tpu.dma_semaphore, #tpu.memory_space<semaphore_mem>>
    tpu.enqueue_dma source(%56 : memref<768xf32, #tpu.memory_space<any>>) target(%58 : memref<768xf32, #tpu.memory_space<any>>) target_semaphore(%60 : memref<!tpu.dma_semaphore, #tpu.memory_space<semaphore_mem>>)
    %c5_i32 = arith.constant 5 : i32
    %61 = arith.addi %0, %c5_i32 : i32
    %62 = arith.index_cast %61 : i32 to index
    %63 = memref.load %arg1[%62] : memref<24xi32, #tpu.memory_space<smem>>
    %c5_i32_20 = arith.constant 5 : i32
    %64 = arith.addi %0, %c5_i32_20 : i32
    %65 = arith.index_cast %64 : i32 to index
    %66 = memref.load %arg2[%65] : memref<24xi32, #tpu.memory_space<smem>>
    %c5_i32_21 = arith.constant 5 : i32
    %c0_i32_22 = arith.constant 0 : i32
    %67 = tpu.memref_slice %arg3[%63, %c0_i32_22] : memref<24x768xf32, #tpu.memory_space<any>> -> memref<1x768xf32, #tpu.memory_space<any>>
    %68 = tpu.memref_squeeze %67 : memref<1x768xf32, #tpu.memory_space<any>> -> memref<768xf32, #tpu.memory_space<any>>
    %c0_i32_23 = arith.constant 0 : i32
    %69 = tpu.memref_slice %arg4[%66, %c0_i32_23] : memref<24x768xf32, #tpu.memory_space<any>> -> memref<1x768xf32, #tpu.memory_space<any>>
    %70 = tpu.memref_squeeze %69 : memref<1x768xf32, #tpu.memory_space<any>> -> memref<768xf32, #tpu.memory_space<any>>
    %71 = tpu.memref_slice %arg5[%c5_i32_21] : memref<16x!tpu.dma_semaphore, #tpu.memory_space<semaphore_mem>> -> memref<1x!tpu.dma_semaphore, #tpu.memory_space<semaphore_mem>>
    %72 = tpu.memref_squeeze %71 : memref<1x!tpu.dma_semaphore, #tpu.memory_space<semaphore_mem>> -> memref<!tpu.dma_semaphore, #tpu.memory_space<semaphore_mem>>
    tpu.enqueue_dma source(%68 : memref<768xf32, #tpu.memory_space<any>>) target(%70 : memref<768xf32, #tpu.memory_space<any>>) target_semaphore(%72 : memref<!tpu.dma_semaphore, #tpu.memory_space<semaphore_mem>>)
    %c6_i32 = arith.constant 6 : i32
    %73 = arith.addi %0, %c6_i32 : i32
    %74 = arith.index_cast %73 : i32 to index
    %75 = memref.load %arg1[%74] : memref<24xi32, #tpu.memory_space<smem>>
    %c6_i32_24 = arith.constant 6 : i32
    %76 = arith.addi %0, %c6_i32_24 : i32
    %77 = arith.index_cast %76 : i32 to index
    %78 = memref.load %arg2[%77] : memref<24xi32, #tpu.memory_space<smem>>
    %c6_i32_25 = arith.constant 6 : i32
    %c0_i32_26 = arith.constant 0 : i32
    %79 = tpu.memref_slice %arg3[%75, %c0_i32_26] : memref<24x768xf32, #tpu.memory_space<any>> -> memref<1x768xf32, #tpu.memory_space<any>>
    %80 = tpu.memref_squeeze %79 : memref<1x768xf32, #tpu.memory_space<any>> -> memref<768xf32, #tpu.memory_space<any>>
    %c0_i32_27 = arith.constant 0 : i32
    %81 = tpu.memref_slice %arg4[%78, %c0_i32_27] : memref<24x768xf32, #tpu.memory_space<any>> -> memref<1x768xf32, #tpu.memory_space<any>>
    %82 = tpu.memref_squeeze %81 : memref<1x768xf32, #tpu.memory_space<any>> -> memref<768xf32, #tpu.memory_space<any>>
    %83 = tpu.memref_slice %arg5[%c6_i32_25] : memref<16x!tpu.dma_semaphore, #tpu.memory_space<semaphore_mem>> -> memref<1x!tpu.dma_semaphore, #tpu.memory_space<semaphore_mem>>
    %84 = tpu.memref_squeeze %83 : memref<1x!tpu.dma_semaphore, #tpu.memory_space<semaphore_mem>> -> memref<!tpu.dma_semaphore, #tpu.memory_space<semaphore_mem>>
    tpu.enqueue_dma source(%80 : memref<768xf32, #tpu.memory_space<any>>) target(%82 : memref<768xf32, #tpu.memory_space<any>>) target_semaphore(%84 : memref<!tpu.dma_semaphore, #tpu.memory_space<semaphore_mem>>)
    %c7_i32 = arith.constant 7 : i32
    %85 = arith.addi %0, %c7_i32 : i32
    %86 = arith.index_cast %85 : i32 to index
    %87 = memref.load %arg1[%86] : memref<24xi32, #tpu.memory_space<smem>>
    %c7_i32_28 = arith.constant 7 : i32
    %88 = arith.addi %0, %c7_i32_28 : i32
    %89 = arith.index_cast %88 : i32 to index
    %90 = memref.load %arg2[%89] : memref<24xi32, #tpu.memory_space<smem>>
    %c7_i32_29 = arith.constant 7 : i32
    %c0_i32_30 = arith.constant 0 : i32
    %91 = tpu.memref_slice %arg3[%87, %c0_i32_30] : memref<24x768xf32, #tpu.memory_space<any>> -> memref<1x768xf32, #tpu.memory_space<any>>
    %92 = tpu.memref_squeeze %91 : memref<1x768xf32, #tpu.memory_space<any>> -> memref<768xf32, #tpu.memory_space<any>>
    %c0_i32_31 = arith.constant 0 : i32
    %93 = tpu.memref_slice %arg4[%90, %c0_i32_31] : memref<24x768xf32, #tpu.memory_space<any>> -> memref<1x768xf32, #tpu.memory_space<any>>
    %94 = tpu.memref_squeeze %93 : memref<1x768xf32, #tpu.memory_space<any>> -> memref<768xf32, #tpu.memory_space<any>>
    %95 = tpu.memref_slice %arg5[%c7_i32_29] : memref<16x!tpu.dma_semaphore, #tpu.memory_space<semaphore_mem>> -> memref<1x!tpu.dma_semaphore, #tpu.memory_space<semaphore_mem>>
    %96 = tpu.memref_squeeze %95 : memref<1x!tpu.dma_semaphore, #tpu.memory_space<semaphore_mem>> -> memref<!tpu.dma_semaphore, #tpu.memory_space<semaphore_mem>>
    tpu.enqueue_dma source(%92 : memref<768xf32, #tpu.memory_space<any>>) target(%94 : memref<768xf32, #tpu.memory_space<any>>) target_semaphore(%96 : memref<!tpu.dma_semaphore, #tpu.memory_space<semaphore_mem>>)
    %c8_i32 = arith.constant 8 : i32
    %97 = arith.addi %0, %c8_i32 : i32
    %98 = arith.index_cast %97 : i32 to index
    %99 = memref.load %arg1[%98] : memref<24xi32, #tpu.memory_space<smem>>
    %c8_i32_32 = arith.constant 8 : i32
    %100 = arith.addi %0, %c8_i32_32 : i32
    %101 = arith.index_cast %100 : i32 to index
    %102 = memref.load %arg2[%101] : memref<24xi32, #tpu.memory_space<smem>>
    %c8_i32_33 = arith.constant 8 : i32
    %c0_i32_34 = arith.constant 0 : i32
    %103 = tpu.memref_slice %arg3[%99, %c0_i32_34] : memref<24x768xf32, #tpu.memory_space<any>> -> memref<1x768xf32, #tpu.memory_space<any>>
    %104 = tpu.memref_squeeze %103 : memref<1x768xf32, #tpu.memory_space<any>> -> memref<768xf32, #tpu.memory_space<any>>
    %c0_i32_35 = arith.constant 0 : i32
    %105 = tpu.memref_slice %arg4[%102, %c0_i32_35] : memref<24x768xf32, #tpu.memory_space<any>> -> memref<1x768xf32, #tpu.memory_space<any>>
    %106 = tpu.memref_squeeze %105 : memref<1x768xf32, #tpu.memory_space<any>> -> memref<768xf32, #tpu.memory_space<any>>
    %107 = tpu.memref_slice %arg5[%c8_i32_33] : memref<16x!tpu.dma_semaphore, #tpu.memory_space<semaphore_mem>> -> memref<1x!tpu.dma_semaphore, #tpu.memory_space<semaphore_mem>>
    %108 = tpu.memref_squeeze %107 : memref<1x!tpu.dma_semaphore, #tpu.memory_space<semaphore_mem>> -> memref<!tpu.dma_semaphore, #tpu.memory_space<semaphore_mem>>
    tpu.enqueue_dma source(%104 : memref<768xf32, #tpu.memory_space<any>>) target(%106 : memref<768xf32, #tpu.memory_space<any>>) target_semaphore(%108 : memref<!tpu.dma_semaphore, #tpu.memory_space<semaphore_mem>>)
    %c9_i32 = arith.constant 9 : i32
    %109 = arith.addi %0, %c9_i32 : i32
    %110 = arith.index_cast %109 : i32 to index
    %111 = memref.load %arg1[%110] : memref<24xi32, #tpu.memory_space<smem>>
    %c9_i32_36 = arith.constant 9 : i32
    %112 = arith.addi %0, %c9_i32_36 : i32
    %113 = arith.index_cast %112 : i32 to index
    %114 = memref.load %arg2[%113] : memref<24xi32, #tpu.memory_space<smem>>
    %c9_i32_37 = arith.constant 9 : i32
    %c0_i32_38 = arith.constant 0 : i32
    %115 = tpu.memref_slice %arg3[%111, %c0_i32_38] : memref<24x768xf32, #tpu.memory_space<any>> -> memref<1x768xf32, #tpu.memory_space<any>>
    %116 = tpu.memref_squeeze %115 : memref<1x768xf32, #tpu.memory_space<any>> -> memref<768xf32, #tpu.memory_space<any>>
    %c0_i32_39 = arith.constant 0 : i32
    %117 = tpu.memref_slice %arg4[%114, %c0_i32_39] : memref<24x768xf32, #tpu.memory_space<any>> -> memref<1x768xf32, #tpu.memory_space<any>>
    %118 = tpu.memref_squeeze %117 : memref<1x768xf32, #tpu.memory_space<any>> -> memref<768xf32, #tpu.memory_space<any>>
    %119 = tpu.memref_slice %arg5[%c9_i32_37] : memref<16x!tpu.dma_semaphore, #tpu.memory_space<semaphore_mem>> -> memref<1x!tpu.dma_semaphore, #tpu.memory_space<semaphore_mem>>
    %120 = tpu.memref_squeeze %119 : memref<1x!tpu.dma_semaphore, #tpu.memory_space<semaphore_mem>> -> memref<!tpu.dma_semaphore, #tpu.memory_space<semaphore_mem>>
    tpu.enqueue_dma source(%116 : memref<768xf32, #tpu.memory_space<any>>) target(%118 : memref<768xf32, #tpu.memory_space<any>>) target_semaphore(%120 : memref<!tpu.dma_semaphore, #tpu.memory_space<semaphore_mem>>)
    %c10_i32 = arith.constant 10 : i32
    %121 = arith.addi %0, %c10_i32 : i32
    %122 = arith.index_cast %121 : i32 to index
    %123 = memref.load %arg1[%122] : memref<24xi32, #tpu.memory_space<smem>>
    %c10_i32_40 = arith.constant 10 : i32
    %124 = arith.addi %0, %c10_i32_40 : i32
    %125 = arith.index_cast %124 : i32 to index
    %126 = memref.load %arg2[%125] : memref<24xi32, #tpu.memory_space<smem>>
    %c10_i32_41 = arith.constant 10 : i32
    %c0_i32_42 = arith.constant 0 : i32
    %127 = tpu.memref_slice %arg3[%123, %c0_i32_42] : memref<24x768xf32, #tpu.memory_space<any>> -> memref<1x768xf32, #tpu.memory_space<any>>
    %128 = tpu.memref_squeeze %127 : memref<1x768xf32, #tpu.memory_space<any>> -> memref<768xf32, #tpu.memory_space<any>>
    %c0_i32_43 = arith.constant 0 : i32
    %129 = tpu.memref_slice %arg4[%126, %c0_i32_43] : memref<24x768xf32, #tpu.memory_space<any>> -> memref<1x768xf32, #tpu.memory_space<any>>
    %130 = tpu.memref_squeeze %129 : memref<1x768xf32, #tpu.memory_space<any>> -> memref<768xf32, #tpu.memory_space<any>>
    %131 = tpu.memref_slice %arg5[%c10_i32_41] : memref<16x!tpu.dma_semaphore, #tpu.memory_space<semaphore_mem>> -> memref<1x!tpu.dma_semaphore, #tpu.memory_space<semaphore_mem>>
    %132 = tpu.memref_squeeze %131 : memref<1x!tpu.dma_semaphore, #tpu.memory_space<semaphore_mem>> -> memref<!tpu.dma_semaphore, #tpu.memory_space<semaphore_mem>>
    tpu.enqueue_dma source(%128 : memref<768xf32, #tpu.memory_space<any>>) target(%130 : memref<768xf32, #tpu.memory_space<any>>) target_semaphore(%132 : memref<!tpu.dma_semaphore, #tpu.memory_space<semaphore_mem>>)
    %c11_i32 = arith.constant 11 : i32
    %133 = arith.addi %0, %c11_i32 : i32
    %134 = arith.index_cast %133 : i32 to index
    %135 = memref.load %arg1[%134] : memref<24xi32, #tpu.memory_space<smem>>
    %c11_i32_44 = arith.constant 11 : i32
    %136 = arith.addi %0, %c11_i32_44 : i32
    %137 = arith.index_cast %136 : i32 to index
    %138 = memref.load %arg2[%137] : memref<24xi32, #tpu.memory_space<smem>>
    %c11_i32_45 = arith.constant 11 : i32
    %c0_i32_46 = arith.constant 0 : i32
    %139 = tpu.memref_slice %arg3[%135, %c0_i32_46] : memref<24x768xf32, #tpu.memory_space<any>> -> memref<1x768xf32, #tpu.memory_space<any>>
    %140 = tpu.memref_squeeze %139 : memref<1x768xf32, #tpu.memory_space<any>> -> memref<768xf32, #tpu.memory_space<any>>
    %c0_i32_47 = arith.constant 0 : i32
    %141 = tpu.memref_slice %arg4[%138, %c0_i32_47] : memref<24x768xf32, #tpu.memory_space<any>> -> memref<1x768xf32, #tpu.memory_space<any>>
    %142 = tpu.memref_squeeze %141 : memref<1x768xf32, #tpu.memory_space<any>> -> memref<768xf32, #tpu.memory_space<any>>
    %143 = tpu.memref_slice %arg5[%c11_i32_45] : memref<16x!tpu.dma_semaphore, #tpu.memory_space<semaphore_mem>> -> memref<1x!tpu.dma_semaphore, #tpu.memory_space<semaphore_mem>>
    %144 = tpu.memref_squeeze %143 : memref<1x!tpu.dma_semaphore, #tpu.memory_space<semaphore_mem>> -> memref<!tpu.dma_semaphore, #tpu.memory_space<semaphore_mem>>
    tpu.enqueue_dma source(%140 : memref<768xf32, #tpu.memory_space<any>>) target(%142 : memref<768xf32, #tpu.memory_space<any>>) target_semaphore(%144 : memref<!tpu.dma_semaphore, #tpu.memory_space<semaphore_mem>>)
    %c12_i32 = arith.constant 12 : i32
    %145 = arith.addi %0, %c12_i32 : i32
    %146 = arith.index_cast %145 : i32 to index
    %147 = memref.load %arg1[%146] : memref<24xi32, #tpu.memory_space<smem>>
    %c12_i32_48 = arith.constant 12 : i32
    %148 = arith.addi %0, %c12_i32_48 : i32
    %149 = arith.index_cast %148 : i32 to index
    %150 = memref.load %arg2[%149] : memref<24xi32, #tpu.memory_space<smem>>
    %c12_i32_49 = arith.constant 12 : i32
    %c0_i32_50 = arith.constant 0 : i32
    %151 = tpu.memref_slice %arg3[%147, %c0_i32_50] : memref<24x768xf32, #tpu.memory_space<any>> -> memref<1x768xf32, #tpu.memory_space<any>>
    %152 = tpu.memref_squeeze %151 : memref<1x768xf32, #tpu.memory_space<any>> -> memref<768xf32, #tpu.memory_space<any>>
    %c0_i32_51 = arith.constant 0 : i32
    %153 = tpu.memref_slice %arg4[%150, %c0_i32_51] : memref<24x768xf32, #tpu.memory_space<any>> -> memref<1x768xf32, #tpu.memory_space<any>>
    %154 = tpu.memref_squeeze %153 : memref<1x768xf32, #tpu.memory_space<any>> -> memref<768xf32, #tpu.memory_space<any>>
    %155 = tpu.memref_slice %arg5[%c12_i32_49] : memref<16x!tpu.dma_semaphore, #tpu.memory_space<semaphore_mem>> -> memref<1x!tpu.dma_semaphore, #tpu.memory_space<semaphore_mem>>
    %156 = tpu.memref_squeeze %155 : memref<1x!tpu.dma_semaphore, #tpu.memory_space<semaphore_mem>> -> memref<!tpu.dma_semaphore, #tpu.memory_space<semaphore_mem>>
    tpu.enqueue_dma source(%152 : memref<768xf32, #tpu.memory_space<any>>) target(%154 : memref<768xf32, #tpu.memory_space<any>>) target_semaphore(%156 : memref<!tpu.dma_semaphore, #tpu.memory_space<semaphore_mem>>)
    %c13_i32 = arith.constant 13 : i32
    %157 = arith.addi %0, %c13_i32 : i32
    %158 = arith.index_cast %157 : i32 to index
    %159 = memref.load %arg1[%158] : memref<24xi32, #tpu.memory_space<smem>>
    %c13_i32_52 = arith.constant 13 : i32
    %160 = arith.addi %0, %c13_i32_52 : i32
    %161 = arith.index_cast %160 : i32 to index
    %162 = memref.load %arg2[%161] : memref<24xi32, #tpu.memory_space<smem>>
    %c13_i32_53 = arith.constant 13 : i32
    %c0_i32_54 = arith.constant 0 : i32
    %163 = tpu.memref_slice %arg3[%159, %c0_i32_54] : memref<24x768xf32, #tpu.memory_space<any>> -> memref<1x768xf32, #tpu.memory_space<any>>
    %164 = tpu.memref_squeeze %163 : memref<1x768xf32, #tpu.memory_space<any>> -> memref<768xf32, #tpu.memory_space<any>>
    %c0_i32_55 = arith.constant 0 : i32
    %165 = tpu.memref_slice %arg4[%162, %c0_i32_55] : memref<24x768xf32, #tpu.memory_space<any>> -> memref<1x768xf32, #tpu.memory_space<any>>
    %166 = tpu.memref_squeeze %165 : memref<1x768xf32, #tpu.memory_space<any>> -> memref<768xf32, #tpu.memory_space<any>>
    %167 = tpu.memref_slice %arg5[%c13_i32_53] : memref<16x!tpu.dma_semaphore, #tpu.memory_space<semaphore_mem>> -> memref<1x!tpu.dma_semaphore, #tpu.memory_space<semaphore_mem>>
    %168 = tpu.memref_squeeze %167 : memref<1x!tpu.dma_semaphore, #tpu.memory_space<semaphore_mem>> -> memref<!tpu.dma_semaphore, #tpu.memory_space<semaphore_mem>>
    tpu.enqueue_dma source(%164 : memref<768xf32, #tpu.memory_space<any>>) target(%166 : memref<768xf32, #tpu.memory_space<any>>) target_semaphore(%168 : memref<!tpu.dma_semaphore, #tpu.memory_space<semaphore_mem>>)
    %c14_i32 = arith.constant 14 : i32
    %169 = arith.addi %0, %c14_i32 : i32
    %170 = arith.index_cast %169 : i32 to index
    %171 = memref.load %arg1[%170] : memref<24xi32, #tpu.memory_space<smem>>
    %c14_i32_56 = arith.constant 14 : i32
    %172 = arith.addi %0, %c14_i32_56 : i32
    %173 = arith.index_cast %172 : i32 to index
    %174 = memref.load %arg2[%173] : memref<24xi32, #tpu.memory_space<smem>>
    %c14_i32_57 = arith.constant 14 : i32
    %c0_i32_58 = arith.constant 0 : i32
    %175 = tpu.memref_slice %arg3[%171, %c0_i32_58] : memref<24x768xf32, #tpu.memory_space<any>> -> memref<1x768xf32, #tpu.memory_space<any>>
    %176 = tpu.memref_squeeze %175 : memref<1x768xf32, #tpu.memory_space<any>> -> memref<768xf32, #tpu.memory_space<any>>
    %c0_i32_59 = arith.constant 0 : i32
    %177 = tpu.memref_slice %arg4[%174, %c0_i32_59] : memref<24x768xf32, #tpu.memory_space<any>> -> memref<1x768xf32, #tpu.memory_space<any>>
    %178 = tpu.memref_squeeze %177 : memref<1x768xf32, #tpu.memory_space<any>> -> memref<768xf32, #tpu.memory_space<any>>
    %179 = tpu.memref_slice %arg5[%c14_i32_57] : memref<16x!tpu.dma_semaphore, #tpu.memory_space<semaphore_mem>> -> memref<1x!tpu.dma_semaphore, #tpu.memory_space<semaphore_mem>>
    %180 = tpu.memref_squeeze %179 : memref<1x!tpu.dma_semaphore, #tpu.memory_space<semaphore_mem>> -> memref<!tpu.dma_semaphore, #tpu.memory_space<semaphore_mem>>
    tpu.enqueue_dma source(%176 : memref<768xf32, #tpu.memory_space<any>>) target(%178 : memref<768xf32, #tpu.memory_space<any>>) target_semaphore(%180 : memref<!tpu.dma_semaphore, #tpu.memory_space<semaphore_mem>>)
    %c15_i32 = arith.constant 15 : i32
    %181 = arith.addi %0, %c15_i32 : i32
    %182 = arith.index_cast %181 : i32 to index
    %183 = memref.load %arg1[%182] : memref<24xi32, #tpu.memory_space<smem>>
    %c15_i32_60 = arith.constant 15 : i32
    %184 = arith.addi %0, %c15_i32_60 : i32
    %185 = arith.index_cast %184 : i32 to index
    %186 = memref.load %arg2[%185] : memref<24xi32, #tpu.memory_space<smem>>
    %c15_i32_61 = arith.constant 15 : i32
    %c0_i32_62 = arith.constant 0 : i32
    %187 = tpu.memref_slice %arg3[%183, %c0_i32_62] : memref<24x768xf32, #tpu.memory_space<any>> -> memref<1x768xf32, #tpu.memory_space<any>>
    %188 = tpu.memref_squeeze %187 : memref<1x768xf32, #tpu.memory_space<any>> -> memref<768xf32, #tpu.memory_space<any>>
    %c0_i32_63 = arith.constant 0 : i32
    %189 = tpu.memref_slice %arg4[%186, %c0_i32_63] : memref<24x768xf32, #tpu.memory_space<any>> -> memref<1x768xf32, #tpu.memory_space<any>>
    %190 = tpu.memref_squeeze %189 : memref<1x768xf32, #tpu.memory_space<any>> -> memref<768xf32, #tpu.memory_space<any>>
    %191 = tpu.memref_slice %arg5[%c15_i32_61] : memref<16x!tpu.dma_semaphore, #tpu.memory_space<semaphore_mem>> -> memref<1x!tpu.dma_semaphore, #tpu.memory_space<semaphore_mem>>
    %192 = tpu.memref_squeeze %191 : memref<1x!tpu.dma_semaphore, #tpu.memory_space<semaphore_mem>> -> memref<!tpu.dma_semaphore, #tpu.memory_space<semaphore_mem>>
    tpu.enqueue_dma source(%188 : memref<768xf32, #tpu.memory_space<any>>) target(%190 : memref<768xf32, #tpu.memory_space<any>>) target_semaphore(%192 : memref<!tpu.dma_semaphore, #tpu.memory_space<semaphore_mem>>)
    %c0_i32_64 = arith.constant 0 : i32
    %c8_i32_65 = arith.constant 8 : i32
    %193 = arith.addi %c0_i32_64, %c8_i32_65 : i32
    %c1_i32_66 = arith.constant 1 : i32
    scf.for %arg6 = %c0_i32_64 to %193 step %c1_i32_66  : i32 {
      %c1_i32_71 = arith.constant 1 : i32
      %195 = arith.muli %arg6, %c1_i32_71 : i32
      %c0_i32_72 = arith.constant 0 : i32
      %196 = arith.addi %c0_i32_72, %195 : i32
      %c16_i32_73 = arith.constant 16 : i32
      %c0_i32_74 = arith.constant 0 : i32
      %197 = arith.cmpi eq, %c16_i32_73, %c0_i32_74 : i32
      %c1_i32_75 = arith.constant 1 : i32
      %198 = arith.select %197, %c1_i32_75, %c16_i32_73 : i32
      %199 = arith.remsi %196, %198 : i32
      %c0_i32_76 = arith.constant 0 : i32
      %200 = arith.cmpi ne, %199, %c0_i32_76 : i32
      %c0_i32_77 = arith.constant 0 : i32
      %201 = arith.cmpi slt, %199, %c0_i32_77 : i32
      %c0_i32_78 = arith.constant 0 : i32
      %202 = arith.cmpi slt, %198, %c0_i32_78 : i32
      %203 = arith.xori %201, %202 : i1
      %204 = arith.andi %203, %200 : i1
      %205 = arith.addi %199, %198 : i32
      %206 = arith.select %204, %205, %199 : i32
      %207 = arith.addi %0, %196 : i32
      %208 = arith.index_cast %207 : i32 to index
      %209 = memref.load %arg1[%208] : memref<24xi32, #tpu.memory_space<smem>>
      %210 = arith.addi %0, %196 : i32
      %211 = arith.index_cast %210 : i32 to index
      %212 = memref.load %arg2[%211] : memref<24xi32, #tpu.memory_space<smem>>
      %c0_i32_79 = arith.constant 0 : i32
      %213 = tpu.memref_slice %arg3[%209, %c0_i32_79] : memref<24x768xf32, #tpu.memory_space<any>> -> memref<1x768xf32, #tpu.memory_space<any>>
      %214 = tpu.memref_squeeze %213 : memref<1x768xf32, #tpu.memory_space<any>> -> memref<768xf32, #tpu.memory_space<any>>
      %c0_i32_80 = arith.constant 0 : i32
      %215 = tpu.memref_slice %arg4[%212, %c0_i32_80] : memref<24x768xf32, #tpu.memory_space<any>> -> memref<1x768xf32, #tpu.memory_space<any>>
      %216 = tpu.memref_squeeze %215 : memref<1x768xf32, #tpu.memory_space<any>> -> memref<768xf32, #tpu.memory_space<any>>
      %217 = tpu.memref_slice %arg5[%206] : memref<16x!tpu.dma_semaphore, #tpu.memory_space<semaphore_mem>> -> memref<1x!tpu.dma_semaphore, #tpu.memory_space<semaphore_mem>>
      %218 = tpu.memref_squeeze %217 : memref<1x!tpu.dma_semaphore, #tpu.memory_space<semaphore_mem>> -> memref<!tpu.dma_semaphore, #tpu.memory_space<semaphore_mem>>
      tpu.wait_dma2 semaphore(%218 : memref<!tpu.dma_semaphore, #tpu.memory_space<semaphore_mem>>) src(%214 : memref<768xf32, #tpu.memory_space<any>>) dst(%216 : memref<768xf32, #tpu.memory_space<any>>)
      %c16_i32_81 = arith.constant 16 : i32
      %219 = arith.addi %196, %c16_i32_81 : i32
      %220 = arith.addi %0, %219 : i32
      %221 = arith.index_cast %220 : i32 to index
      %222 = memref.load %arg1[%221] : memref<24xi32, #tpu.memory_space<smem>>
      %223 = arith.addi %0, %219 : i32
      %224 = arith.index_cast %223 : i32 to index
      %225 = memref.load %arg2[%224] : memref<24xi32, #tpu.memory_space<smem>>
      %c0_i32_82 = arith.constant 0 : i32
      %226 = tpu.memref_slice %arg3[%222, %c0_i32_82] : memref<24x768xf32, #tpu.memory_space<any>> -> memref<1x768xf32, #tpu.memory_space<any>>
      %227 = tpu.memref_squeeze %226 : memref<1x768xf32, #tpu.memory_space<any>> -> memref<768xf32, #tpu.memory_space<any>>
      %c0_i32_83 = arith.constant 0 : i32
      %228 = tpu.memref_slice %arg4[%225, %c0_i32_83] : memref<24x768xf32, #tpu.memory_space<any>> -> memref<1x768xf32, #tpu.memory_space<any>>
      %229 = tpu.memref_squeeze %228 : memref<1x768xf32, #tpu.memory_space<any>> -> memref<768xf32, #tpu.memory_space<any>>
      %230 = tpu.memref_slice %arg5[%206] : memref<16x!tpu.dma_semaphore, #tpu.memory_space<semaphore_mem>> -> memref<1x!tpu.dma_semaphore, #tpu.memory_space<semaphore_mem>>
      %231 = tpu.memref_squeeze %230 : memref<1x!tpu.dma_semaphore, #tpu.memory_space<semaphore_mem>> -> memref<!tpu.dma_semaphore, #tpu.memory_space<semaphore_mem>>
      tpu.enqueue_dma source(%227 : memref<768xf32, #tpu.memory_space<any>>) target(%229 : memref<768xf32, #tpu.memory_space<any>>) target_semaphore(%231 : memref<!tpu.dma_semaphore, #tpu.memory_space<semaphore_mem>>)
    }
    %c8_i32_67 = arith.constant 8 : i32
    %c0_i32_68 = arith.constant 0 : i32
    %c16_i32 = arith.constant 16 : i32
    %194 = arith.addi %c0_i32_68, %c16_i32 : i32
    %c1_i32_69 = arith.constant 1 : i32
    scf.for %arg6 = %c0_i32_68 to %194 step %c1_i32_69  : i32 {
      %c1_i32_71 = arith.constant 1 : i32
      %195 = arith.muli %arg6, %c1_i32_71 : i32
      %c8_i32_72 = arith.constant 8 : i32
      %196 = arith.addi %c8_i32_72, %195 : i32
      %c16_i32_73 = arith.constant 16 : i32
      %c0_i32_74 = arith.constant 0 : i32
      %197 = arith.cmpi eq, %c16_i32_73, %c0_i32_74 : i32
      %c1_i32_75 = arith.constant 1 : i32
      %198 = arith.select %197, %c1_i32_75, %c16_i32_73 : i32
      %199 = arith.remsi %196, %198 : i32
      %c0_i32_76 = arith.constant 0 : i32
      %200 = arith.cmpi ne, %199, %c0_i32_76 : i32
      %c0_i32_77 = arith.constant 0 : i32
      %201 = arith.cmpi slt, %199, %c0_i32_77 : i32
      %c0_i32_78 = arith.constant 0 : i32
      %202 = arith.cmpi slt, %198, %c0_i32_78 : i32
      %203 = arith.xori %201, %202 : i1
      %204 = arith.andi %203, %200 : i1
      %205 = arith.addi %199, %198 : i32
      %206 = arith.select %204, %205, %199 : i32
      %207 = arith.addi %0, %196 : i32
      %208 = arith.index_cast %207 : i32 to index
      %209 = memref.load %arg1[%208] : memref<24xi32, #tpu.memory_space<smem>>
      %210 = arith.addi %0, %196 : i32
      %211 = arith.index_cast %210 : i32 to index
      %212 = memref.load %arg2[%211] : memref<24xi32, #tpu.memory_space<smem>>
      %c0_i32_79 = arith.constant 0 : i32
      %213 = tpu.memref_slice %arg3[%209, %c0_i32_79] : memref<24x768xf32, #tpu.memory_space<any>> -> memref<1x768xf32, #tpu.memory_space<any>>
      %214 = tpu.memref_squeeze %213 : memref<1x768xf32, #tpu.memory_space<any>> -> memref<768xf32, #tpu.memory_space<any>>
      %c0_i32_80 = arith.constant 0 : i32
      %215 = tpu.memref_slice %arg4[%212, %c0_i32_80] : memref<24x768xf32, #tpu.memory_space<any>> -> memref<1x768xf32, #tpu.memory_space<any>>
      %216 = tpu.memref_squeeze %215 : memref<1x768xf32, #tpu.memory_space<any>> -> memref<768xf32, #tpu.memory_space<any>>
      %217 = tpu.memref_slice %arg5[%206] : memref<16x!tpu.dma_semaphore, #tpu.memory_space<semaphore_mem>> -> memref<1x!tpu.dma_semaphore, #tpu.memory_space<semaphore_mem>>
      %218 = tpu.memref_squeeze %217 : memref<1x!tpu.dma_semaphore, #tpu.memory_space<semaphore_mem>> -> memref<!tpu.dma_semaphore, #tpu.memory_space<semaphore_mem>>
      tpu.wait_dma2 semaphore(%218 : memref<!tpu.dma_semaphore, #tpu.memory_space<semaphore_mem>>) src(%214 : memref<768xf32, #tpu.memory_space<any>>) dst(%216 : memref<768xf32, #tpu.memory_space<any>>)
    }
    %c16_i32_70 = arith.constant 16 : i32
    return
  }
}

</mosaic_0001>

<bundles_post_ra>
// kernel: tpu_custom_call.1
= control target key start
LH: loop header
LB: loop body
LE: loop exit
PB: predicated region body
PF: predicated region fallthrough
CT: control target
= control target key end

     0   :  { %s1359_s0 = inlined_call_operand.hbm [shape: s32[24], index: 0, kind: input, shape index: {}]   ;;  %s1360_s2 = inlined_call_operand.hbm [shape: f32[24,768], index: 2, kind: input, shape index: {}]   ;;  %s1361_s3 = inlined_call_operand.hbm [shape: f32[24,768], index: 3, kind: output, shape index: {}]   ;;  %s1362_s1 = inlined_call_operand.vmem [shape: s32[24], index: 1, kind: input, shape index: {}]  }
   0x1   :  { %s1061_s14 = scalar_lea.hbm %s1359_s0, 16 }
   0x2   :  { %p1062_p0 = scmp.ne.s32.totalorder %s1359_s0, %s1061_s14  ;;  %p1065_p1 = scmp.lt.u32.totalorder %s1061_s14, %s1359_s0 }
   0x4   :  { %p1067_p2 = pnand %p1065_p1, %p1062_p0 }
   0x6   :  { %1070 = shalt.err (!%p1067_p2)  }
   0x7   :  { %s1105_s19 = smov [#allocation4]   ;;  %s10_s24 = sshll.u32 %s1362_s1, 4  ;;  %s11_s24 = int_to_ptr.vmem [resolvable:$true] %s10_s24 }
   0x8   :  { %9 = dma.hbm_to_smem %s1359_s0, 16, %s1105_s19, [#allocation3] }
   0x9   :  { %s1071_s25 = scalar_lea.vmem %s11_s24, 16  ;;  %p1076_p4 = scmp.lt.s32.totalorder %s11_s24, %s11_s24 }
   0xa   :  { %p1072_p3 = scmp.ne.s32.totalorder %s11_s24, %s1071_s25  ;;  %p1077_p5 = scmp.lt.s32.totalorder %s1071_s25, %s1071_s25 }
   0xc   :  { %p1078_p6 = por %p1077_p5, %p1076_p4 }
   0xe   :  { %p1079_p7 = pnand %p1078_p6, %p1072_p3 }
  0x10   :  { %1082 = shalt.err (!%p1079_p7)  }
  0x11   :  { %s1106_s26 = smov [#allocation5]  }
  0x12   :  { %13 = dma.vmem_to_smem %s11_s24, 16, %s1106_s26, [#allocation3] }
  0x13   :  { %1091 = dma.done.wait [#allocation3], 32 }
  0x14   :  { %1092 = vsyncadd [#allocation3], 4294967264 }
  0x15   :  { %15 = sfence }
  0x16   :  { %s17_s27 = sld [smem:[#allocation4]]  ;;  %s1107_s0 = smov 128  }
  0x17   :  { %s18_s28 = sld [smem:[#allocation5]]  ;;  %45 = sst [smem:[#allocation7 + $0x1]] %s1107_s0 }
  0x18   :  { %43 = sst [smem:[#allocation7]] %s1107_s0  ;;  %s1108_s1 = smov 1  }
  0x19   :  { %47 = sst [smem:[#allocation7 + $0x2]] %s1108_s1  ;;  %s1109_s18 = smov [#allocation2]  }
  0x1a   :  { %s1110_s19 = smov [#allocation6]   ;;  %s1111_s20 = smov 0  }
  0x1b   :  { %s1112_s12 = smov [#allocation2 + $0x1]  }
  0x1c   :  { %s19_s29 = sshrl.u32 %s17_s27, 3  ;;  %s20_s30 = sand.u32 7, %s17_s27  }
  0x1d   :  { %s21_s4 = smul.u32 48, %s19_s29  ;;  %s25_s5 = sshrl.u32 %s18_s28, 3 }
  0x1e   :  { %s26_s6 = sand.u32 7, %s18_s28   ;;  %s27_s7 = smul.u32 48, %s25_s5 }
  0x1f   :  { %s22_s8 = sadd.s32 %s21_s4, %s20_s30 }
  0x20   :  { %s918_s9 = sshll.u32 %s22_s8, 4  ;;  %s28_s10 = sadd.s32 %s27_s7, %s26_s6 }
  0x21   :  { %s24_s13 = scalar_lea.hbm %s1360_s2, %s918_s9  ;;  %s919_s14 = sshll.u32 %s28_s10, 4 }
  0x22   :  { %s30_s17 = scalar_lea.hbm %s1361_s3, %s919_s14  ;;  %s1114_s6 = smov [#allocation2 + $0x2]  }
  0x23   :  { %49 = dma.general %s24_s13, 96, %s30_s17, %s1109_s18, %s1110_s19, [#allocation7], %s1111_s20, 0  }
  0x24   :  { %s920_s21 = sld [smem:[#allocation4 + $0x1]]  ;;  %78 = sst [smem:[#allocation9]] %s1107_s0 }
  0x25   :  { %s921_s22 = sld [smem:[#allocation5 + $0x1]]  ;;  %82 = sst [smem:[#allocation9 + $0x2]] %s1108_s1 }
  0x26   :  { %80 = sst [smem:[#allocation9 + $0x1]] %s1107_s0  ;;  %s1113_s13 = smov [#allocation8]  }
  0x2a   :  { %s53_s23 = sshrl.u32 %s920_s21, 3  ;;  %s54_s24 = sand.u32 7, %s920_s21  }
  0x2b   :  { %s55_s25 = smul.u32 48, %s53_s23  ;;  %s59_s26 = sshrl.u32 %s921_s22, 3 }
  0x2c   :  { %s60_s27 = sand.u32 7, %s921_s22   ;;  %s61_s28 = smul.u32 48, %s59_s26 }
  0x2d   :  { %s56_s29 = sadd.s32 %s55_s25, %s54_s24 }
  0x2e   :  { %s922_s30 = sshll.u32 %s56_s29, 4  ;;  %s62_s4 = sadd.s32 %s61_s28, %s60_s27 }
  0x2f   :  { %s58_s7 = scalar_lea.hbm %s1360_s2, %s922_s30  ;;  %s923_s8 = sshll.u32 %s62_s4, 4 }
  0x30   :  { %s64_s11 = scalar_lea.hbm %s1361_s3, %s923_s8  ;;  %s1116_s27 = smov [#allocation2 + $0x3]  }
  0x31   :  { %84 = dma.general %s58_s7, 96, %s64_s11, %s1112_s12, %s1113_s13, [#allocation9], %s1111_s20, 0  }
  0x32   :  { %s924_s14 = sld [smem:[#allocation4 + $0x2]]  ;;  %113 = sst [smem:[#allocation11]] %s1107_s0 }
  0x33   :  { %s925_s15 = sld [smem:[#allocation5 + $0x2]]  ;;  %115 = sst [smem:[#allocation11 + $0x1]] %s1107_s0 }
  0x34   :  { %117 = sst [smem:[#allocation11 + $0x2]] %s1108_s1  ;;  %s1115_s7 = smov [#allocation10]  }
  0x38   :  { %s88_s16 = sshrl.u32 %s924_s14, 3  ;;  %s89_s17 = sand.u32 7, %s924_s14  }
  0x39   :  { %s90_s18 = smul.u32 48, %s88_s16  ;;  %s94_s19 = sshrl.u32 %s925_s15, 3 }
  0x3a   :  { %s95_s21 = sand.u32 7, %s925_s15   ;;  %s96_s22 = smul.u32 48, %s94_s19 }
  0x3b   :  { %s91_s23 = sadd.s32 %s90_s18, %s89_s17 }
  0x3c   :  { %s926_s24 = sshll.u32 %s91_s23, 4  ;;  %s97_s25 = sadd.s32 %s96_s22, %s95_s21 }
  0x3d   :  { %s93_s28 = scalar_lea.hbm %s1360_s2, %s926_s24  ;;  %s927_s29 = sshll.u32 %s97_s25, 4 }
  0x3e   :  { %s99_s5 = scalar_lea.hbm %s1361_s3, %s927_s29  ;;  %s1118_s21 = smov [#allocation2 + $0x4]  }
  0x3f   :  { %119 = dma.general %s93_s28, 96, %s99_s5, %s1114_s6, %s1115_s7, [#allocation11], %s1111_s20, 0  }
  0x40   :  { %s928_s8 = sld [smem:[#allocation4 + $0x3]]  ;;  %148 = sst [smem:[#allocation13]] %s1107_s0 }
  0x41   :  { %s929_s9 = sld [smem:[#allocation5 + $0x3]]  ;;  %150 = sst [smem:[#allocation13 + $0x1]] %s1107_s0 }
  0x42   :  { %152 = sst [smem:[#allocation13 + $0x2]] %s1108_s1  ;;  %s1117_s28 = smov [#allocation12]  }
  0x46   :  { %s123_s10 = sshrl.u32 %s928_s8, 3  ;;  %s124_s11 = sand.u32 7, %s928_s8  }
  0x47   :  { %s125_s12 = smul.u32 48, %s123_s10  ;;  %s129_s13 = sshrl.u32 %s929_s9, 3 }
  0x48   :  { %s130_s14 = sand.u32 7, %s929_s9   ;;  %s131_s15 = smul.u32 48, %s129_s13 }
  0x49   :  { %s126_s16 = sadd.s32 %s125_s12, %s124_s11 }
  0x4a   :  { %s930_s17 = sshll.u32 %s126_s16, 4  ;;  %s132_s18 = sadd.s32 %s131_s15, %s130_s14 }
  0x4b   :  { %s128_s22 = scalar_lea.hbm %s1360_s2, %s930_s17  ;;  %s931_s23 = sshll.u32 %s132_s18, 4 }
  0x4c   :  { %s134_s26 = scalar_lea.hbm %s1361_s3, %s931_s23  ;;  %s1120_s14 = smov [#allocation2 + $0x5]  }
  0x4d   :  { %154 = dma.general %s128_s22, 96, %s134_s26, %s1116_s27, %s1117_s28, [#allocation13], %s1111_s20, 0  }
  0x4e   :  { %s932_s29 = sld [smem:[#allocation4 + $0x4]]  ;;  %183 = sst [smem:[#allocation15]] %s1107_s0 }
  0x4f   :  { %s933_s30 = sld [smem:[#allocation5 + $0x4]]  ;;  %185 = sst [smem:[#allocation15 + $0x1]] %s1107_s0 }
  0x50   :  { %187 = sst [smem:[#allocation15 + $0x2]] %s1108_s1  ;;  %s1119_s22 = smov [#allocation14]  }
  0x54   :  { %s158_s4 = sshrl.u32 %s932_s29, 3  ;;  %s159_s5 = sand.u32 7, %s932_s29  }
  0x55   :  { %s160_s6 = smul.u32 48, %s158_s4  ;;  %s164_s7 = sshrl.u32 %s933_s30, 3 }
  0x56   :  { %s165_s8 = sand.u32 7, %s933_s30   ;;  %s166_s9 = smul.u32 48, %s164_s7 }
  0x57   :  { %s161_s10 = sadd.s32 %s160_s6, %s159_s5 }
  0x58   :  { %s934_s11 = sshll.u32 %s161_s10, 4  ;;  %s167_s12 = sadd.s32 %s166_s9, %s165_s8 }
  0x59   :  { %s163_s15 = scalar_lea.hbm %s1360_s2, %s934_s11  ;;  %s935_s16 = sshll.u32 %s167_s12, 4 }
  0x5a   :  { %s169_s19 = scalar_lea.hbm %s1361_s3, %s935_s16  ;;  %s1122_s8 = smov [#allocation2 + $0x6]  }
  0x5b   :  { %189 = dma.general %s163_s15, 96, %s169_s19, %s1118_s21, %s1119_s22, [#allocation15], %s1111_s20, 0  }
  0x5c   :  { %s936_s23 = sld [smem:[#allocation4 + $0x5]]  ;;  %218 = sst [smem:[#allocation17]] %s1107_s0 }
  0x5d   :  { %s937_s24 = sld [smem:[#allocation5 + $0x5]]  ;;  %220 = sst [smem:[#allocation17 + $0x1]] %s1107_s0 }
  0x5e   :  { %222 = sst [smem:[#allocation17 + $0x2]] %s1108_s1  ;;  %s1121_s15 = smov [#allocation16]  }
  0x62   :  { %s193_s25 = sshrl.u32 %s936_s23, 3  ;;  %s194_s26 = sand.u32 7, %s936_s23  }
  0x63   :  { %s195_s27 = smul.u32 48, %s193_s25  ;;  %s199_s28 = sshrl.u32 %s937_s24, 3 }
  0x64   :  { %s200_s29 = sand.u32 7, %s937_s24   ;;  %s201_s30 = smul.u32 48, %s199_s28 }
  0x65   :  { %s196_s4 = sadd.s32 %s195_s27, %s194_s26 }
  0x66   :  { %s938_s5 = sshll.u32 %s196_s4, 4  ;;  %s202_s6 = sadd.s32 %s201_s30, %s200_s29 }
  0x67   :  { %s198_s9 = scalar_lea.hbm %s1360_s2, %s938_s5  ;;  %s939_s10 = sshll.u32 %s202_s6, 4 }
  0x68   :  { %s204_s13 = scalar_lea.hbm %s1361_s3, %s939_s10  ;;  %s1124_s29 = smov [#allocation2 + $0x7]  }
  0x69   :  { %224 = dma.general %s198_s9, 96, %s204_s13, %s1120_s14, %s1121_s15, [#allocation17], %s1111_s20, 0  }
  0x6a   :  { %s940_s16 = sld [smem:[#allocation4 + $0x6]]  ;;  %253 = sst [smem:[#allocation19]] %s1107_s0 }
  0x6b   :  { %s941_s17 = sld [smem:[#allocation5 + $0x6]]  ;;  %255 = sst [smem:[#allocation19 + $0x1]] %s1107_s0 }
  0x6c   :  { %257 = sst [smem:[#allocation19 + $0x2]] %s1108_s1  ;;  %s1123_s9 = smov [#allocation18]  }
  0x70   :  { %s228_s18 = sshrl.u32 %s940_s16, 3  ;;  %s229_s19 = sand.u32 7, %s940_s16  }
  0x71   :  { %s230_s21 = smul.u32 48, %s228_s18  ;;  %s234_s22 = sshrl.u32 %s941_s17, 3 }
  0x72   :  { %s235_s23 = sand.u32 7, %s941_s17   ;;  %s236_s24 = smul.u32 48, %s234_s22 }
  0x73   :  { %s231_s25 = sadd.s32 %s230_s21, %s229_s19 }
  0x74   :  { %s942_s26 = sshll.u32 %s231_s25, 4  ;;  %s237_s27 = sadd.s32 %s236_s24, %s235_s23 }
  0x75   :  { %s233_s30 = scalar_lea.hbm %s1360_s2, %s942_s26  ;;  %s943_s4 = sshll.u32 %s237_s27, 4 }
  0x76   :  { %s239_s7 = scalar_lea.hbm %s1361_s3, %s943_s4  ;;  %s1126_s23 = smov [#allocation2 + $0x8]  }
  0x77   :  { %259 = dma.general %s233_s30, 96, %s239_s7, %s1122_s8, %s1123_s9, [#allocation19], %s1111_s20, 0  }
  0x78   :  { %s944_s10 = sld [smem:[#allocation4 + $0x7]]  ;;  %288 = sst [smem:[#allocation21]] %s1107_s0 }
  0x79   :  { %s945_s11 = sld [smem:[#allocation5 + $0x7]]  ;;  %290 = sst [smem:[#allocation21 + $0x1]] %s1107_s0 }
  0x7a   :  { %292 = sst [smem:[#allocation21 + $0x2]] %s1108_s1  ;;  %s1125_s30 = smov [#allocation20]  }
  0x7e   :  { %s263_s12 = sshrl.u32 %s944_s10, 3  ;;  %s264_s13 = sand.u32 7, %s944_s10  }
  0x7f   :  { %s265_s14 = smul.u32 48, %s263_s12  ;;  %s269_s15 = sshrl.u32 %s945_s11, 3 }
  0x80   :  { %s270_s16 = sand.u32 7, %s945_s11   ;;  %s271_s17 = smul.u32 48, %s269_s15 }
  0x81   :  { %s266_s18 = sadd.s32 %s265_s14, %s264_s13 }
  0x82   :  { %s946_s19 = sshll.u32 %s266_s18, 4  ;;  %s272_s21 = sadd.s32 %s271_s17, %s270_s16 }
  0x83   :  { %s268_s24 = scalar_lea.hbm %s1360_s2, %s946_s19  ;;  %s947_s25 = sshll.u32 %s272_s21, 4 }
  0x84   :  { %s274_s28 = scalar_lea.hbm %s1361_s3, %s947_s25  ;;  %s1128_s16 = smov [#allocation2 + $0x9]  }
  0x85   :  { %294 = dma.general %s268_s24, 96, %s274_s28, %s1124_s29, %s1125_s30, [#allocation21], %s1111_s20, 0  }
  0x86   :  { %s948_s4 = sld [smem:[#allocation4 + $0x8]]  ;;  %325 = sst [smem:[#allocation23 + $0x1]] %s1107_s0 }
  0x87   :  { %s949_s5 = sld [smem:[#allocation5 + $0x8]]  ;;  %327 = sst [smem:[#allocation23 + $0x2]] %s1108_s1 }
  0x88   :  { %323 = sst [smem:[#allocation23]] %s1107_s0  ;;  %s1127_s24 = smov [#allocation22]  }
  0x8c   :  { %s298_s6 = sshrl.u32 %s948_s4, 3  ;;  %s299_s7 = sand.u32 7, %s948_s4  }
  0x8d   :  { %s300_s8 = smul.u32 48, %s298_s6  ;;  %s304_s9 = sshrl.u32 %s949_s5, 3 }
  0x8e   :  { %s305_s10 = sand.u32 7, %s949_s5   ;;  %s306_s11 = smul.u32 48, %s304_s9 }
  0x8f   :  { %s301_s12 = sadd.s32 %s300_s8, %s299_s7 }
  0x90   :  { %s950_s13 = sshll.u32 %s301_s12, 4  ;;  %s307_s14 = sadd.s32 %s306_s11, %s305_s10 }
  0x91   :  { %s303_s17 = scalar_lea.hbm %s1360_s2, %s950_s13  ;;  %s951_s18 = sshll.u32 %s307_s14, 4 }
  0x92   :  { %s309_s22 = scalar_lea.hbm %s1361_s3, %s951_s18  ;;  %s1130_s10 = smov [#allocation2 + $0xa]  }
  0x93   :  { %329 = dma.general %s303_s17, 96, %s309_s22, %s1126_s23, %s1127_s24, [#allocation23], %s1111_s20, 0  }
  0x94   :  { %s952_s25 = sld [smem:[#allocation4 + $0x9]]  ;;  %358 = sst [smem:[#allocation25]] %s1107_s0 }
  0x95   :  { %s953_s26 = sld [smem:[#allocation5 + $0x9]]  ;;  %362 = sst [smem:[#allocation25 + $0x2]] %s1108_s1 }
  0x96   :  { %360 = sst [smem:[#allocation25 + $0x1]] %s1107_s0  ;;  %s1129_s17 = smov [#allocation24]  }
  0x9a   :  { %s333_s27 = sshrl.u32 %s952_s25, 3  ;;  %s334_s28 = sand.u32 7, %s952_s25  }
  0x9b   :  { %s335_s29 = smul.u32 48, %s333_s27  ;;  %s339_s30 = sshrl.u32 %s953_s26, 3 }
  0x9c   :  { %s340_s4 = sand.u32 7, %s953_s26   ;;  %s341_s5 = smul.u32 48, %s339_s30 }
  0x9d   :  { %s336_s6 = sadd.s32 %s335_s29, %s334_s28 }
  0x9e   :  { %s954_s7 = sshll.u32 %s336_s6, 4  ;;  %s342_s8 = sadd.s32 %s341_s5, %s340_s4 }
  0x9f   :  { %s338_s11 = scalar_lea.hbm %s1360_s2, %s954_s7  ;;  %s955_s12 = sshll.u32 %s342_s8, 4 }
  0xa0   :  { %s344_s15 = scalar_lea.hbm %s1361_s3, %s955_s12  ;;  %s1132_s4 = smov [#allocation2 + $0xb]  }
  0xa1   :  { %364 = dma.general %s338_s11, 96, %s344_s15, %s1128_s16, %s1129_s17, [#allocation25], %s1111_s20, 0  }
  0xa2   :  { %s956_s18 = sld [smem:[#allocation4 + $0xa]]  ;;  %393 = sst [smem:[#allocation27]] %s1107_s0 }
  0xa3   :  { %s957_s19 = sld [smem:[#allocation5 + $0xa]]  ;;  %395 = sst [smem:[#allocation27 + $0x1]] %s1107_s0 }
  0xa4   :  { %397 = sst [smem:[#allocation27 + $0x2]] %s1108_s1  ;;  %s1131_s11 = smov [#allocation26]  }
  0xa8   :  { %s368_s21 = sshrl.u32 %s956_s18, 3  ;;  %s369_s22 = sand.u32 7, %s956_s18  }
  0xa9   :  { %s370_s23 = smul.u32 48, %s368_s21  ;;  %s374_s24 = sshrl.u32 %s957_s19, 3 }
  0xaa   :  { %s375_s25 = sand.u32 7, %s957_s19   ;;  %s376_s26 = smul.u32 48, %s374_s24 }
  0xab   :  { %s371_s27 = sadd.s32 %s370_s23, %s369_s22 }
  0xac   :  { %s958_s28 = sshll.u32 %s371_s27, 4  ;;  %s377_s29 = sadd.s32 %s376_s26, %s375_s25 }
  0xad   :  { %s373_s5 = scalar_lea.hbm %s1360_s2, %s958_s28  ;;  %s959_s6 = sshll.u32 %s377_s29, 4 }
  0xae   :  { %s379_s9 = scalar_lea.hbm %s1361_s3, %s959_s6  ;;  %s1134_s25 = smov [#allocation2 + $0xc]  }
  0xaf   :  { %399 = dma.general %s373_s5, 96, %s379_s9, %s1130_s10, %s1131_s11, [#allocation27], %s1111_s20, 0  }
  0xb0   :  { %s960_s12 = sld [smem:[#allocation4 + $0xb]]  ;;  %428 = sst [smem:[#allocation29]] %s1107_s0 }
  0xb1   :  { %s961_s13 = sld [smem:[#allocation5 + $0xb]]  ;;  %430 = sst [smem:[#allocation29 + $0x1]] %s1107_s0 }
  0xb2   :  { %432 = sst [smem:[#allocation29 + $0x2]] %s1108_s1  ;;  %s1133_s5 = smov [#allocation28]  }
  0xb6   :  { %s403_s14 = sshrl.u32 %s960_s12, 3  ;;  %s404_s15 = sand.u32 7, %s960_s12  }
  0xb7   :  { %s405_s16 = smul.u32 48, %s403_s14  ;;  %s409_s17 = sshrl.u32 %s961_s13, 3 }
  0xb8   :  { %s410_s18 = sand.u32 7, %s961_s13   ;;  %s411_s19 = smul.u32 48, %s409_s17 }
  0xb9   :  { %s406_s21 = sadd.s32 %s405_s16, %s404_s15 }
  0xba   :  { %s962_s22 = sshll.u32 %s406_s21, 4  ;;  %s412_s23 = sadd.s32 %s411_s19, %s410_s18 }
  0xbb   :  { %s408_s26 = scalar_lea.hbm %s1360_s2, %s962_s22  ;;  %s963_s27 = sshll.u32 %s412_s23, 4 }
  0xbc   :  { %s414_s30 = scalar_lea.hbm %s1361_s3, %s963_s27  ;;  %s1136_s18 = smov [#allocation2 + $0xd]  }
  0xbd   :  { %434 = dma.general %s408_s26, 96, %s414_s30, %s1132_s4, %s1133_s5, [#allocation29], %s1111_s20, 0  }
  0xbe   :  { %s964_s6 = sld [smem:[#allocation4 + $0xc]]  ;;  %463 = sst [smem:[#allocation31]] %s1107_s0 }
  0xbf   :  { %s965_s7 = sld [smem:[#allocation5 + $0xc]]  ;;  %465 = sst [smem:[#allocation31 + $0x1]] %s1107_s0 }
  0xc0   :  { %467 = sst [smem:[#allocation31 + $0x2]] %s1108_s1  ;;  %s1135_s26 = smov [#allocation30]  }
  0xc4   :  { %s438_s8 = sshrl.u32 %s964_s6, 3  ;;  %s439_s9 = sand.u32 7, %s964_s6  }
  0xc5   :  { %s440_s10 = smul.u32 48, %s438_s8  ;;  %s444_s11 = sshrl.u32 %s965_s7, 3 }
  0xc6   :  { %s445_s12 = sand.u32 7, %s965_s7   ;;  %s446_s13 = smul.u32 48, %s444_s11 }
  0xc7   :  { %s441_s14 = sadd.s32 %s440_s10, %s439_s9 }
  0xc8   :  { %s966_s15 = sshll.u32 %s441_s14, 4  ;;  %s447_s16 = sadd.s32 %s446_s13, %s445_s12 }
  0xc9   :  { %s443_s19 = scalar_lea.hbm %s1360_s2, %s966_s15  ;;  %s967_s21 = sshll.u32 %s447_s16, 4 }
  0xca   :  { %s449_s24 = scalar_lea.hbm %s1361_s3, %s967_s21  ;;  %s1138_s12 = smov [#allocation2 + $0xe]  }
  0xcb   :  { %469 = dma.general %s443_s19, 96, %s449_s24, %s1134_s25, %s1135_s26, [#allocation31], %s1111_s20, 0  }
  0xcc   :  { %s968_s27 = sld [smem:[#allocation4 + $0xd]]  ;;  %498 = sst [smem:[#allocation33]] %s1107_s0 }
  0xcd   :  { %s969_s28 = sld [smem:[#allocation5 + $0xd]]  ;;  %500 = sst [smem:[#allocation33 + $0x1]] %s1107_s0 }
  0xce   :  { %502 = sst [smem:[#allocation33 + $0x2]] %s1108_s1  ;;  %s1137_s19 = smov [#allocation32]  }
  0xd2   :  { %s473_s29 = sshrl.u32 %s968_s27, 3  ;;  %s474_s30 = sand.u32 7, %s968_s27  }
  0xd3   :  { %s475_s4 = smul.u32 48, %s473_s29  ;;  %s479_s5 = sshrl.u32 %s969_s28, 3 }
  0xd4   :  { %s480_s6 = sand.u32 7, %s969_s28   ;;  %s481_s7 = smul.u32 48, %s479_s5 }
  0xd5   :  { %s476_s8 = sadd.s32 %s475_s4, %s474_s30  ;;  %s1140_s5 = smov [#allocation2 + $0xf]  }
  0xd6   :  { %s970_s9 = sshll.u32 %s476_s8, 4  ;;  %s482_s10 = sadd.s32 %s481_s7, %s480_s6 }
  0xd7   :  { %s478_s13 = scalar_lea.hbm %s1360_s2, %s970_s9  ;;  %s971_s14 = sshll.u32 %s482_s10, 4 }
  0xd8   :  { %s484_s17 = scalar_lea.hbm %s1361_s3, %s971_s14  ;;  %s1341_s6 = smov 0  }
  0xd9   :  { %504 = dma.general %s478_s13, 96, %s484_s17, %s1136_s18, %s1137_s19, [#allocation33], %s1111_s20, 0  }
  0xda   :  { %s972_s21 = sld [smem:[#allocation4 + $0xe]]  ;;  %533 = sst [smem:[#allocation35]] %s1107_s0 }
  0xdb   :  { %s973_s22 = sld [smem:[#allocation5 + $0xe]]  ;;  %535 = sst [smem:[#allocation35 + $0x1]] %s1107_s0 }
  0xdc   :  { %537 = sst [smem:[#allocation35 + $0x2]] %s1108_s1  ;;  %s1139_s13 = smov [#allocation34]  }
  0xe0   :  { %s508_s23 = sshrl.u32 %s972_s21, 3  ;;  %s509_s24 = sand.u32 7, %s972_s21  }
  0xe1   :  { %s510_s25 = smul.u32 48, %s508_s23  ;;  %s514_s26 = sshrl.u32 %s973_s22, 3 }
  0xe2   :  { %s515_s27 = sand.u32 7, %s973_s22   ;;  %s516_s28 = smul.u32 48, %s514_s26 }
  0xe3   :  { %s511_s29 = sadd.s32 %s510_s25, %s509_s24 }
  0xe4   :  { %s974_s30 = sshll.u32 %s511_s29, 4  ;;  %s517_s4 = sadd.s32 %s516_s28, %s515_s27 }
  0xe5   :  { %s513_s7 = scalar_lea.hbm %s1360_s2, %s974_s30  ;;  %s975_s8 = sshll.u32 %s517_s4, 4 }
  0xe6   :  { %s519_s11 = scalar_lea.hbm %s1361_s3, %s975_s8 }
  0xe7   :  { %539 = dma.general %s513_s7, 96, %s519_s11, %s1138_s12, %s1139_s13, [#allocation35], %s1111_s20, 0  }
  0xe8   :  { %s976_s14 = sld [smem:[#allocation4 + $0xf]]  ;;  %568 = sst [smem:[#allocation37]] %s1107_s0 }
  0xe9   :  { %s977_s15 = sld [smem:[#allocation5 + $0xf]]  ;;  %570 = sst [smem:[#allocation37 + $0x1]] %s1107_s0 }
  0xea   :  { %572 = sst [smem:[#allocation37 + $0x2]] %s1108_s1  ;;  %s1141_s1 = smov [#allocation36]  }
  0xee   :  { %s543_s16 = sshrl.u32 %s976_s14, 3  ;;  %s544_s17 = sand.u32 7, %s976_s14  }
  0xef   :  { %s545_s18 = smul.u32 48, %s543_s16  ;;  %s549_s19 = sshrl.u32 %s977_s15, 3 }
  0xf0   :  { %s550_s21 = sand.u32 7, %s977_s15   ;;  %s551_s22 = smul.u32 48, %s549_s19 }
  0xf1   :  { %s546_s23 = sadd.s32 %s545_s18, %s544_s17 }
  0xf2   :  { %s978_s24 = sshll.u32 %s546_s23, 4  ;;  %s552_s25 = sadd.s32 %s551_s22, %s550_s21 }
  0xf3   :  { %s548_s28 = scalar_lea.hbm %s1360_s2, %s978_s24  ;;  %s979_s29 = sshll.u32 %s552_s25, 4 }
  0xf4   :  { %s554_s0 = scalar_lea.hbm %s1361_s3, %s979_s29 }
  0xf5   :  { %574 = dma.general %s548_s28, 96, %s554_s0, %s1140_s5, %s1141_s1, [#allocation37], %s1111_s20, 0  }
  0xf6 LB: > { %p581_p8 = scmp.lt.s32.totalorder %s1099_s6, 0  ;;  %s582_s7 = ssub.s32 0, %s1099_s6  ;;  %s1099_s6 = sphi %s1341_s6, %s580_s6  }
  0xf7   : > { %s980_s8 = smin.u32 %s1099_s6, %s582_s7 }
  0xf8   : > { %s584_s9 = sand.u32 15, %s980_s8  }
  0xf9   : > { %s585_s10 = ssub.s32 0, %s584_s9 }
  0xfa   : > { %s1364_s10 = smov (!%p581_p8, %s585_s10), %s584_s9 }
  0xfb   : > { %p982_p9 = scmp.lt.s32.totalorder %s1364_s10, 0  ;;  %s591_s11 = sadd.s32 16, %s1364_s10 }
  0xfd   : > { %s1366_s11 = smov (!%p982_p9, %s591_s11), %s1364_s10 }
  0xfe   : > { %s596_s20 = scalar_lea.sflag [#allocation2], %s1366_s11 }
  0xff   : > { %1093 = dma.done.wait %s596_s20, 96 }
 0x100   : > { %1094 = vsyncadd %s596_s20, 4294967200  ;;  %s599_s12 = sadd.s32 16, %s1099_s6  ;;  %s1142_s15 = smov 128  }
 0x101   : > { %s601_s13 = sld [smem:[#allocation4 + %s599_s12]]  ;;  %s1143_s16 = smov 1  }
 0x102   : > { %s602_s14 = sld [smem:[#allocation5 + %s599_s12]]  ;;  %s1144_s1 = smov [#allocation38]  }
 0x103   : > { %627 = sst [smem:[#allocation39]] %s1142_s15  ;;  %s1145_s7 = smov 0  }
 0x104   : > { %629 = sst [smem:[#allocation39 + $0x1]] %s1142_s15  ;;  %s580_s6 = sadd.s32 1, %s1099_s6  }
 0x105   : > { %631 = sst [smem:[#allocation39 + $0x2]] %s1143_s16  ;;  %p577_p10 = scmp.ge.s32.totalorder %s580_s6, 8  }
 0x106   :  { %s1101_s8 = smov (%p577_p10), 0  }
 0x107   : > { %s603_s17 = sshrl.u32 %s601_s13, 3  ;;  %s604_s18 = sand.u32 7, %s601_s13  }
 0x108   : > { %s605_s19 = smul.u32 48, %s603_s17  ;;  %s609_s21 = sshrl.u32 %s602_s14, 3 }
 0x109   : > { %s610_s22 = sand.u32 7, %s602_s14   ;;  %s611_s23 = smul.u32 48, %s609_s21 }
 0x10a   : > { %s606_s24 = sadd.s32 %s605_s19, %s604_s18  ;;  %579 = sbr.rel (!%p577_p10) target bundleno = 246 (0xf6), region = 126 }
 0x10b   : > { %s983_s25 = sshll.u32 %s606_s24, 4  ;;  %s612_s26 = sadd.s32 %s611_s23, %s610_s22 }
 0x10c   : > { %s608_s29 = scalar_lea.hbm %s1360_s2, %s983_s25  ;;  %s984_s30 = sshll.u32 %s612_s26, 4 }
 0x10d   : > { %s614_s5 = scalar_lea.hbm %s1361_s3, %s984_s30 }
 0x10e   : > { %633 = dma.general %s608_s29, 96, %s614_s5, %s596_s20, %s1144_s1, [#allocation39], %s1145_s7, 0  }
 0x111 LB: > { %s640_s9 = sadd.s32 8, %s1103_s8  ;;  %s1103_s8 = sphi %s1101_s8, %s639_s8  }
 0x112   : > { %p641_p11 = scmp.lt.s32.totalorder %s640_s9, 0  ;;  %s642_s10 = ssub.s32 0, %s640_s9 }
 0x113   : > { %s985_s11 = smin.u32 %s642_s10, %s640_s9 }
 0x114   : > { %s644_s12 = sand.u32 15, %s985_s11  }
 0x115   : > { %s645_s13 = ssub.s32 0, %s644_s12 }
 0x116   : > { %s1368_s13 = smov (!%p641_p11, %s645_s13), %s644_s12 }
 0x117   : > { %p987_p12 = scmp.lt.s32.totalorder %s1368_s13, 0  ;;  %s651_s14 = sadd.s32 16, %s1368_s13 }
 0x119   : > { %s1370_s14 = smov (!%p987_p12, %s651_s14), %s1368_s13 }
 0x11a   : > { %s656_s20 = scalar_lea.sflag [#allocation2], %s1370_s14 }
 0x11b   : > { %1095 = dma.done.wait %s656_s20, 96 }
 0x11c   : > { %1096 = vsyncadd %s656_s20, 4294967200  ;;  %s639_s8 = sadd.s32 1, %s1103_s8  }
 0x11d   : > { %p636_p13 = scmp.ge.s32.totalorder %s639_s8, 16  }
 0x11f   :  { %638 = sbr.rel (!%p636_p13) target bundleno = 273 (0x111), region = 137 }
 0x126   :  { %659 = vsyncmov [#allocation2] }
 0x129   :  { %s660_s2 = vpop.sfrf %659 }
 0x12a   :  { %p988_p0 = scmp.ne.s32.totalorder %s660_s2, 0 }
 0x12c   :  { %664 = shalt.err (%p988_p0)  }
 0x12d   :  { %666 = vsyncmov [#allocation2 + $0x1] }
 0x130   :  { %s667_s3 = vpop.sfrf %666 }
 0x131   :  { %p989_p1 = scmp.ne.s32.totalorder %s667_s3, 0 }
 0x133   :  { %671 = shalt.err (%p989_p1)  }
 0x134   :  { %673 = vsyncmov [#allocation2 + $0x2] }
 0x137   :  { %s674_s6 = vpop.sfrf %673 }
 0x138   :  { %p990_p2 = scmp.ne.s32.totalorder %s674_s6, 0 }
 0x13a   :  { %678 = shalt.err (%p990_p2)  }
 0x13b   :  { %680 = vsyncmov [#allocation2 + $0x3] }
 0x13e   :  { %s681_s15 = vpop.sfrf %680 }
 0x13f   :  { %p991_p3 = scmp.ne.s32.totalorder %s681_s15, 0 }
 0x141   :  { %685 = shalt.err (%p991_p3)  }
 0x142   :  { %687 = vsyncmov [#allocation2 + $0x4] }
 0x145   :  { %s688_s16 = vpop.sfrf %687 }
 0x146   :  { %p992_p4 = scmp.ne.s32.totalorder %s688_s16, 0 }
 0x148   :  { %692 = shalt.err (%p992_p4)  }
 0x149   :  { %694 = vsyncmov [#allocation2 + $0x5] }
 0x14c   :  { %s695_s17 = vpop.sfrf %694 }
 0x14d   :  { %p993_p5 = scmp.ne.s32.totalorder %s695_s17, 0 }
 0x14f   :  { %699 = shalt.err (%p993_p5)  }
 0x150   :  { %701 = vsyncmov [#allocation2 + $0x6] }
 0x153   :  { %s702_s18 = vpop.sfrf %701 }
 0x154   :  { %p994_p6 = scmp.ne.s32.totalorder %s702_s18, 0 }
 0x156   :  { %706 = shalt.err (%p994_p6)  }
 0x157   :  { %708 = vsyncmov [#allocation2 + $0x7] }
 0x15a   :  { %s709_s19 = vpop.sfrf %708 }
 0x15b   :  { %p995_p7 = scmp.ne.s32.totalorder %s709_s19, 0 }
 0x15d   :  { %713 = shalt.err (%p995_p7)  }
 0x15e   :  { %715 = vsyncmov [#allocation2 + $0x8] }
 0x161   :  { %s716_s21 = vpop.sfrf %715 }
 0x162   :  { %p996_p8 = scmp.ne.s32.totalorder %s716_s21, 0 }
 0x164   :  { %720 = shalt.err (%p996_p8)  }
 0x165   :  { %722 = vsyncmov [#allocation2 + $0x9] }
 0x168   :  { %s723_s22 = vpop.sfrf %722 }
 0x169   :  { %p997_p9 = scmp.ne.s32.totalorder %s723_s22, 0 }
 0x16b   :  { %727 = shalt.err (%p997_p9)  }
 0x16c   :  { %729 = vsyncmov [#allocation2 + $0xa] }
 0x16f   :  { %s730_s23 = vpop.sfrf %729 }
 0x170   :  { %p998_p10 = scmp.ne.s32.totalorder %s730_s23, 0 }
 0x172   :  { %734 = shalt.err (%p998_p10)  }
 0x173   :  { %736 = vsyncmov [#allocation2 + $0xb] }
 0x176   :  { %s737_s24 = vpop.sfrf %736 }
 0x177   :  { %p999_p11 = scmp.ne.s32.totalorder %s737_s24, 0 }
 0x179   :  { %741 = shalt.err (%p999_p11)  }
 0x17a   :  { %743 = vsyncmov [#allocation2 + $0xc] }
 0x17d   :  { %s744_s25 = vpop.sfrf %743 }
 0x17e   :  { %p1000_p12 = scmp.ne.s32.totalorder %s744_s25, 0 }
 0x180   :  { %748 = shalt.err (%p1000_p12)  }
 0x181   :  { %750 = vsyncmov [#allocation2 + $0xd] }
 0x184   :  { %s751_s26 = vpop.sfrf %750 }
 0x185   :  { %p1001_p13 = scmp.ne.s32.totalorder %s751_s26, 0 }
 0x187   :  { %755 = shalt.err (%p1001_p13)  }
 0x188   :  { %757 = vsyncmov [#allocation2 + $0xe] }
 0x18b   :  { %s758_s27 = vpop.sfrf %757 }
 0x18c   :  { %p1002_p0 = scmp.ne.s32.totalorder %s758_s27, 0 }
 0x18e   :  { %762 = shalt.err (%p1002_p0)  }
 0x18f   :  { %764 = vsyncmov [#allocation2 + $0xf] }
 0x192   :  { %s765_s28 = vpop.sfrf %764 }
 0x193   :  { %p1003_p1 = scmp.ne.s32.totalorder %s765_s28, 0 }
 0x195   :  { %769 = shalt.err (%p1003_p1)  }

</bundles_post_ra>
